<compile_context>
chip_gen: v7x
topology: tpu7x:2x2x1
jax: 0.10.0
libtpu: 0.0.40
codegen_flags: <defaults>
</compile_context>

<pallas_src>
import jax
import jax.numpy as jnp
from jax.experimental import pallas as pl
from jax.experimental.pallas import tpu as pltpu


def _byol_loss_kernel(q1_ref, q2_ref, z1_ref, z2_ref, cos_ref):
    """Writes cos(q1,z1) + cos(q2,z2) per row of this (TN, D) tile -> (TN, 1)."""

    def cos_rows(q_ref, z_ref):
        # products in the native input dtype, accumulation in f32
        q = q_ref[...]
        z = z_ref[...]
        dot = jnp.sum(q * z, axis=1, keepdims=True, dtype=jnp.float32)  # [TN,1]
        qq = jnp.sum(q * q, axis=1, keepdims=True, dtype=jnp.float32)   # [TN,1]
        zz = jnp.sum(z * z, axis=1, keepdims=True, dtype=jnp.float32)   # [TN,1]
        # one EUP rsqrt instead of 2 sqrt + 1 divide
        return dot * jax.lax.rsqrt(qq * zz)                             # [TN,1]

    # Rows of the (possibly partial) last tile that fall past N are garbage but
    # are masked out by Pallas on the partial-output-block writeback, so they
    # never reach HBM -- no in-kernel mask needed, full tiles pay nothing.
    cos_ref[...] = cos_rows(q1_ref, z1_ref) + cos_rows(q2_ref, z2_ref)


def _vmem_budget():
    """Generation-aware (buffer_budget_bytes, vmem_limit_bytes)."""
    try:
        vmem_cap = pltpu.get_tpu_info().vmem_capacity_bytes
    except Exception:
        vmem_cap = 64 * 1024 * 1024  # conservative fallback (v7x per-TC)
    if vmem_cap >= 96 * 1024 * 1024:
        # v5e / v6e: 128 MiB physical VMEM -> large tiles, generous scoped limit
        return 72 * 1024 * 1024, 96 * 1024 * 1024
    # v7x: 64 MiB physical per TC -> keep double-buffering headroom
    return 44 * 1024 * 1024, 56 * 1024 * 1024


def byol_loss(q1, q2, z1, z2, *, tn=None):
    """q1, q2, z1, z2: [N, D] arrays. Returns the scalar BYOL loss (float32)."""
    n, d = q1.shape
    assert q2.shape == (n, d) and z1.shape == (n, d) and z2.shape == (n, d)
    itemsize = jnp.dtype(q1.dtype).itemsize

    # packed-sublane row multiple: 8 for f32, 16 for bf16, 32 for 8-bit dtypes
    row_mult = max(8, 32 // itemsize)
    buf_budget, vmem_limit = _vmem_budget()

    if tn is None:
        # 4 inputs x 2 pipeline buffers per input (+ tiny (TN,1) f32 output
        # double buffer); size TN purely from the VMEM budget, no row cap.
        bytes_per_row = 8 * d * itemsize + 2 * 4
        tn = max(row_mult, buf_budget // bytes_per_row)
    tn = min(tn, n)
    if tn < n:
        # keep the sublane dim a multiple of the packed tile height
        tn = max(row_mult, (tn // row_mult) * row_mult)
    num_tiles = pl.cdiv(n, tn)

    in_spec = pl.BlockSpec((tn, d), lambda i: (i, 0))
    cos = pl.pallas_call(
        _byol_loss_kernel,
        out_shape=jax.ShapeDtypeStruct((n, 1), jnp.float32),
        grid_spec=pltpu.PrefetchScalarGridSpec(
            num_scalar_prefetch=0,
            grid=(num_tiles,),
            in_specs=[in_spec, in_spec, in_spec, in_spec],
            out_specs=pl.BlockSpec((tn, 1), lambda i: (i, 0)),
        ),
        compiler_params=pltpu.CompilerParams(
            # every grid step owns its own output block -> fully parallel
            # (both TensorCores on v7x; no-op on single-TC v5e/v6e)
            dimension_semantics=("parallel",),
            vmem_limit_bytes=vmem_limit,
        ),
    )(q1, q2, z1, z2)

    # mean(l1 + l2) = 4 - (2/N) * sum(cos1 + cos2); tiny pairwise sum in XLA.
    return 4.0 - (2.0 / n) * jnp.sum(cos)


if __name__ == "__main__":
    key = jax.random.PRNGKey(0)
    k1, k2, k3, k4 = jax.random.split(key, 4)
    # Small demo shapes: N not a multiple of the explicit tile, so the tiled
    # call exercises the parallel grid and the partial last input/output block.
    N, D = 20, 256
    q1 = jax.random.normal(k1, (N, D), dtype=jnp.float32)
    q2 = jax.random.normal(k2, (N, D), dtype=jnp.float32)
    z1 = jax.random.normal(k3, (N, D), dtype=jnp.float32)
    z2 = jax.random.normal(k4, (N, D), dtype=jnp.float32)

    loss_tiled = byol_loss(q1, q2, z1, z2, tn=8)  # 3 grid steps, last partial
    loss_auto = byol_loss(q1, q2, z1, z2)         # auto TN -> single full tile
    jax.block_until_ready((loss_tiled, loss_auto))

    # plain-JAX reference
    def ref_l(q, z):
        return 2 - 2 * jnp.sum(q * z, axis=1) / (
            jnp.linalg.norm(q, axis=1) * jnp.linalg.norm(z, axis=1))

    ref = jnp.mean(ref_l(q1, z1) + ref_l(q2, z2))
    assert jnp.allclose(loss_tiled, ref, atol=1e-5, rtol=1e-5), (loss_tiled, ref)
    assert jnp.allclose(loss_auto, ref, atol=1e-5, rtol=1e-5), (loss_auto, ref)
    print("KERNEL_OK")
</pallas_src>

<mosaic_0001>
module attributes {stable_mosaic.version = 11 : i64} {
  func.func @_byol_loss_kernel(%arg0: i32, %arg1: memref<8x256xf32, #tpu.memory_space<vmem>>, %arg2: memref<8x256xf32, #tpu.memory_space<vmem>>, %arg3: memref<8x256xf32, #tpu.memory_space<vmem>>, %arg4: memref<8x256xf32, #tpu.memory_space<vmem>>, %arg5: memref<8x1xf32, #tpu.memory_space<vmem>>) attributes {dimension_semantics = [#tpu.dimension_semantics<parallel>], iteration_bounds = array<i64: 3>, scalar_prefetch = 0 : i64, scratch_operands = 0 : i64, tpu.core_type = #tpu.core_type<tc>, window_params = [{transform_indices = @transform_0, window_bounds = array<i64: 8, 256>}, {transform_indices = @transform_1, window_bounds = array<i64: 8, 256>}, {transform_indices = @transform_2, window_bounds = array<i64: 8, 256>}, {transform_indices = @transform_3, window_bounds = array<i64: 8, 256>}, {transform_indices = @transform_4, window_bounds = array<i64: 8, 1>}]} {
    %c0 = arith.constant 0 : index
    %c0_0 = arith.constant 0 : index
    %0 = vector.load %arg1[%c0, %c0_0] : memref<8x256xf32, #tpu.memory_space<vmem>>, vector<8x256xf32>
    %c0_1 = arith.constant 0 : index
    %c0_2 = arith.constant 0 : index
    %1 = vector.load %arg3[%c0_1, %c0_2] : memref<8x256xf32, #tpu.memory_space<vmem>>, vector<8x256xf32>
    %2 = arith.mulf %0, %1 : vector<8x256xf32>
    %cst = arith.constant dense<0.000000e+00> : vector<8xf32>
    %3 = vector.multi_reduction <add>, %2, %cst [1] : vector<8x256xf32> to vector<8xf32>
    %4 = vector.shape_cast %3 : vector<8xf32> to vector<8x1xf32>
    %5 = arith.mulf %0, %0 : vector<8x256xf32>
    %cst_3 = arith.constant dense<0.000000e+00> : vector<8xf32>
    %6 = vector.multi_reduction <add>, %5, %cst_3 [1] : vector<8x256xf32> to vector<8xf32>
    %7 = vector.shape_cast %6 : vector<8xf32> to vector<8x1xf32>
    %8 = arith.mulf %1, %1 : vector<8x256xf32>
    %cst_4 = arith.constant dense<0.000000e+00> : vector<8xf32>
    %9 = vector.multi_reduction <add>, %8, %cst_4 [1] : vector<8x256xf32> to vector<8xf32>
    %10 = vector.shape_cast %9 : vector<8xf32> to vector<8x1xf32>
    %11 = arith.mulf %7, %10 : vector<8x1xf32>
    %12 = math.rsqrt %11 : vector<8x1xf32>
    %13 = arith.mulf %4, %12 : vector<8x1xf32>
    %c0_5 = arith.constant 0 : index
    %c0_6 = arith.constant 0 : index
    %14 = vector.load %arg2[%c0_5, %c0_6] : memref<8x256xf32, #tpu.memory_space<vmem>>, vector<8x256xf32>
    %c0_7 = arith.constant 0 : index
    %c0_8 = arith.constant 0 : index
    %15 = vector.load %arg4[%c0_7, %c0_8] : memref<8x256xf32, #tpu.memory_space<vmem>>, vector<8x256xf32>
    %16 = arith.mulf %14, %15 : vector<8x256xf32>
    %cst_9 = arith.constant dense<0.000000e+00> : vector<8xf32>
    %17 = vector.multi_reduction <add>, %16, %cst_9 [1] : vector<8x256xf32> to vector<8xf32>
    %18 = vector.shape_cast %17 : vector<8xf32> to vector<8x1xf32>
    %19 = arith.mulf %14, %14 : vector<8x256xf32>
    %cst_10 = arith.constant dense<0.000000e+00> : vector<8xf32>
    %20 = vector.multi_reduction <add>, %19, %cst_10 [1] : vector<8x256xf32> to vector<8xf32>
    %21 = vector.shape_cast %20 : vector<8xf32> to vector<8x1xf32>
    %22 = arith.mulf %15, %15 : vector<8x256xf32>
    %cst_11 = arith.constant dense<0.000000e+00> : vector<8xf32>
    %23 = vector.multi_reduction <add>, %22, %cst_11 [1] : vector<8x256xf32> to vector<8xf32>
    %24 = vector.shape_cast %23 : vector<8xf32> to vector<8x1xf32>
    %25 = arith.mulf %21, %24 : vector<8x1xf32>
    %26 = math.rsqrt %25 : vector<8x1xf32>
    %27 = arith.mulf %18, %26 : vector<8x1xf32>
    %28 = arith.addf %13, %27 : vector<8x1xf32>
    %c0_12 = arith.constant 0 : index
    %c0_13 = arith.constant 0 : index
    %29 = vector.load %arg5[%c0_12, %c0_13] : memref<8x1xf32, #tpu.memory_space<vmem>>, vector<8x1xf32>
    tpu.vector_store %arg5[%c0_12, %c0_13], %28 {strides = array<i32>} : memref<8x1xf32, #tpu.memory_space<vmem>>, vector<8x1xf32>,
    return
  }
  func.func @transform_0(%arg0: i32) -> (i32, i32) {
    %c0_i32 = arith.constant 0 : i32
    %c0_i32_0 = arith.constant 0 : i32
    return %arg0, %c0_i32 : i32, i32
  }
  func.func @transform_1(%arg0: i32) -> (i32, i32) {
    %c0_i32 = arith.constant 0 : i32
    %c0_i32_0 = arith.constant 0 : i32
    return %arg0, %c0_i32 : i32, i32
  }
  func.func @transform_2(%arg0: i32) -> (i32, i32) {
    %c0_i32 = arith.constant 0 : i32
    %c0_i32_0 = arith.constant 0 : i32
    return %arg0, %c0_i32 : i32, i32
  }
  func.func @transform_3(%arg0: i32) -> (i32, i32) {
    %c0_i32 = arith.constant 0 : i32
    %c0_i32_0 = arith.constant 0 : i32
    return %arg0, %c0_i32 : i32, i32
  }
  func.func @transform_4(%arg0: i32) -> (i32, i32) {
    %c0_i32 = arith.constant 0 : i32
    %c0_i32_0 = arith.constant 0 : i32
    return %arg0, %c0_i32 : i32, i32
  }
}

</mosaic_0001>

<bundles_post_ra>
// kernel: tpu_custom_call.1
= control target key start
LH: loop header
LB: loop body
LE: loop exit
PB: predicated region body
PF: predicated region fallthrough
CT: control target
= control target key end

     0   :  { %9 = vsyncpa [#allocation3], 0  ;;  %s999_s0 = inlined_call_operand.hbm [shape: f32[20,256], index: 0, kind: input, shape index: {}]   ;;  %s1000_s1 = inlined_call_operand.hbm [shape: f32[20,256], index: 1, kind: input, shape index: {}]   ;;  %s1001_s2 = inlined_call_operand.hbm [shape: f32[20,256], index: 2, kind: input, shape index: {}]   ;;  %s1002_s3 = inlined_call_operand.hbm [shape: f32[20,256], index: 3, kind: input, shape index: {}]   ;;  %s1003_s4 = inlined_call_operand.vmem [shape: f32[20,1], index: 4, kind: output, shape index: {}]  }
   0x1   :  { %11 = vsyncpa [#allocation3 + $0x1], 0 }
   0x2   :  { %12 = vsyncpa [#allocation5], 0 }
   0x3   :  { %14 = vsyncpa [#allocation5 + $0x1], 0 }
   0x4   :  { %15 = vsyncpa [#allocation8], 0 }
   0x5   :  { %17 = vsyncpa [#allocation8 + $0x1], 0  ;;  %s781_s15 = smov 0   ;;  %s783_s16 = smov 0  }
   0x6   :  { %s785_s17 = smov 0   ;;  %s787_s18 = smov 0  }
   0x7 LB: > { %s800_s19 = sadd.s32 4294967295, %s750_s18   ;;  %s803_s20 = sadd.s32 1, %s750_s18   ;;  %s750_s18 = sphi %s787_s18, %s1020_s18   ;;  %s746_s17 = sphi %s785_s17, %s1019_s17   ;;  %s742_s16 = sphi %s783_s16, %s1018_s16   ;;  %s738_s15 = sphi %s781_s15, %s1017_s15  }
   0x8   : > { %s27_s21 = ssub.s32 %s750_s18, %s803_s20  ;;  %s30_s22 = sadd.s32 1, %s746_s17 }
   0x9   : > { %p28_p0 = scmp.eq.s32.totalorder %s27_s21, 0  ;;  %p37_p1 = scmp.ne.s32.totalorder %s746_s17, %s742_s16 }
   0xa   : > { %p38_p2 = scmp.eq.s32.totalorder %s750_s18, 0  ;;  %p43_p3 = scmp.ne.s32.totalorder %s742_s16, %s738_s15 }
   0xb   : > { %s813_s23 = scalar_select %p28_p0, %s746_s17, %s30_s22  }
   0xc   : > { %p39_p4 = por %p38_p2, %p37_p1  ;;  %p44_p5 = scmp.eq.s32.totalorder %s800_s19, 0 }
   0xd   : > { %p551_p6 = scmp.lt.s32.totalorder %s750_s18, 3  ;;  %s822_s25 = sand.u32 1, %s746_s17  }
   0xe   : > { %p817_p7 = por %p44_p5, %p43_p3  ;;  %s825_s26 = sshll.u32 %s822_s25, 4 }
   0xf   : > { %s828_s27 = sshll.u32 %s750_s18, 8  ;;  %p830_p8 = pnand %p551_p6, %p39_p4 }
  0x10   : > { %s1007_s24 = scalar_select %p817_p7, 1, 0 }
  0x11   : > { %s1008_s28 = scalar_select %p830_p8, 1, 0 }
  0x12   : > { %s190_s29 = sand.u32 1, %s750_s18   ;;  %s839_s6 = scalar_lea.hbm %s1000_s1, %s828_s27 }
  0x13   : > { %s194_s7 = scalar_lea.vmem [#allocation4], %s825_s26  ;;  %s846_s9 = scalar_lea.sflag [#allocation5], %s190_s29 }
  0x14   : > { %s202_s8 = sshll.u32 %s194_s7, 4  ;;  %s588_s10 = scalar_lea.hbm %s839_s6, 256  ;;  %s843_s8 = int_to_ptr.vmem [resolvable:$true] %s202_s8 }
  0x15   : > { %p589_p11 = scmp.ne.s32.totalorder %s839_s6, %s588_s10  ;;  %p852_p12 = pneg %p830_p8 }
  0x16   : > { %s593_s14 = scalar_lea.hbm %s1000_s1, 768  ;;  %p594_p1 = scmp.lt.u32.totalorder %s839_s6, %s1000_s1 }
  0x17   : > { %p591_p13 = pnand %p852_p12, %p589_p11  ;;  %p595_p2 = scmp.lt.u32.totalorder %s593_s14, %s588_s10 }
  0x18   : > { %p597_p4 = scmp.lt.u32.totalorder %s588_s10, %s839_s6 }
  0x19   : > { %p592_p0 = pneg %p591_p13  ;;  %p596_p3 = por %p595_p2, %p594_p1 }
  0x1b   : > { %p598_p5 = por %p597_p4, %p596_p3 }
  0x1d   : > { %p599_p6 = pnand %p598_p5, %p592_p0 }
  0x1f   : > { %602 = shalt.err (!%p599_p6)
}
  0x20   : > { %s603_s22 = scalar_lea.vmem %s843_s8, 256  ;;  %s752_s29 = smov [#allocation4]  }
  0x21   : > { %p604_p11 = scmp.ne.s32.totalorder %s843_s8, %s603_s22  ;;  %s608_s30 = sshll.u32 %s752_s29, 4  ;;  %s609_s30 = int_to_ptr.vmem [resolvable:$false] %s608_s30 }
  0x22   : > { %s610_s5 = scalar_lea.vmem %s609_s30, 512  ;;  %p611_p10 = scmp.lt.s32.totalorder %s843_s8, %s609_s30 }
  0x23   : > { %p606_p13 = pnand %p604_p11, %p852_p12  ;;  %p612_p7 = scmp.lt.s32.totalorder %s610_s5, %s603_s22 }
  0x25   : > { %p607_p9 = pneg %p606_p13  ;;  %p613_p1 = por %p612_p7, %p611_p10 }
  0x27   : > { %p614_p2 = pnand %p613_p1, %p607_p9 }
  0x29   : > { %617 = shalt.err (!%p614_p2)
}
  0x2a   : > { %544 = dma.hbm_to_vmem [thread:$0]  (!%p830_p8), %s839_s6, 256, %s843_s8, %s846_s9  }
  0x2b   : > { %p1010_p0 = scmp.lt.s32.totalorder %s750_s18, 4  ;;  %p1011_p3 = scmp.ge.s32.totalorder %s750_s18, 1 }
  0x2c   : > { %s888_s13 = scalar_lea.hbm %s999_s0, %s828_s27  ;;  %s175_s14 = scalar_lea.vmem [#allocation2], %s825_s26 }
  0x2d   : > { %p880_p4 = pnand %p1011_p3, %p1010_p0  ;;  %s183_s15 = sshll.u32 %s175_s14, 4  ;;  %s891_s15 = int_to_ptr.vmem [resolvable:$true] %s183_s15 }
  0x2e   : > { %s897_s18 = scalar_lea.hbm %s1001_s2, %s828_s27  ;;  %s172_s21 = scalar_lea.sflag [#allocation3], %s822_s25 }
  0x2f   : > { %s1012_s7 = scalar_select %p880_p4, 1, 0 }
  0x30   : > { %s618_s22 = scalar_lea.hbm %s888_s13, 256  ;;  %s623_s5 = scalar_lea.hbm %s999_s0, 768 }
  0x31   : > { %p619_p7 = scmp.ne.s32.totalorder %s888_s13, %s618_s22  ;;  %p624_p5 = scmp.lt.u32.totalorder %s888_s13, %s999_s0 }
  0x32   : > { %p625_p6 = scmp.lt.u32.totalorder %s623_s5, %s618_s22  ;;  %p627_p13 = scmp.lt.u32.totalorder %s618_s22, %s888_s13 }
  0x33   : > { %p621_p9 = pnand %p619_p7, %p852_p12 }
  0x34   : > { %p626_p11 = por %p625_p6, %p624_p5 }
  0x35   : > { %p622_p10 = pneg %p621_p9 }
  0x36   : > { %p628_p1 = por %p627_p13, %p626_p11 }
  0x38   : > { %p629_p2 = pnand %p628_p1, %p622_p10 }
  0x3a   : > { %632 = shalt.err (!%p629_p2)
}
  0x3b   : > { %s633_s14 = scalar_lea.vmem %s891_s15, 256  ;;  %s753_s6 = smov [#allocation2]  }
  0x3c   : > { %p634_p0 = scmp.ne.s32.totalorder %s891_s15, %s633_s14  ;;  %s638_s8 = sshll.u32 %s753_s6, 4  ;;  %s639_s8 = int_to_ptr.vmem [resolvable:$false] %s638_s8 }
  0x3d   : > { %s640_s29 = scalar_lea.vmem %s639_s8, 512  ;;  %p641_p9 = scmp.lt.s32.totalorder %s891_s15, %s639_s8 }
  0x3e   : > { %p636_p3 = pnand %p634_p0, %p852_p12  ;;  %p642_p4 = scmp.lt.s32.totalorder %s640_s29, %s633_s14 }
  0x40   : > { %p637_p7 = pneg %p636_p3  ;;  %p643_p5 = por %p642_p4, %p641_p9 }
  0x42   : > { %p644_p6 = pnand %p643_p5, %p637_p7 }
  0x44   : > { %647 = shalt.err (!%p644_p6)
}
  0x45   : > { %541 = dma.hbm_to_vmem [thread:$0]  (!%p830_p8), %s888_s13, 256, %s891_s15, %s172_s21  }
  0x46   : > { %s213_s22 = scalar_lea.vmem [#allocation6], %s825_s26  ;;  %s648_s5 = scalar_lea.hbm %s897_s18, 256 }
  0x47   : > { %s221_s30 = sshll.u32 %s213_s22, 4  ;;  %p649_p10 = scmp.ne.s32.totalorder %s897_s18, %s648_s5  ;;  %s222_s30 = int_to_ptr.vmem [resolvable:$true] %s221_s30 }
  0x48   : > { %s653_s14 = scalar_lea.hbm %s1001_s2, 768  ;;  %p654_p13 = scmp.lt.u32.totalorder %s897_s18, %s1001_s2 }
  0x49   : > { %p651_p4 = pnand %p649_p10, %p852_p12  ;;  %p655_p1 = scmp.lt.u32.totalorder %s653_s14, %s648_s5 }
  0x4a   : > { %p657_p0 = scmp.lt.u32.totalorder %s648_s5, %s897_s18 }
  0x4b   : > { %p652_p11 = pneg %p651_p4  ;;  %p656_p2 = por %p655_p1, %p654_p13 }
  0x4d   : > { %p658_p3 = por %p657_p0, %p656_p2 }
  0x4f   : > { %p659_p7 = pnand %p658_p3, %p652_p11 }
  0x51   : > { %662 = shalt.err (!%p659_p7)
}
  0x52   : > { %s663_s13 = scalar_lea.vmem %s222_s30, 256  ;;  %s754_s15 = smov [#allocation6]  }
  0x53   : > { %p664_p9 = scmp.ne.s32.totalorder %s222_s30, %s663_s13  ;;  %s668_s21 = sshll.u32 %s754_s15, 4  ;;  %s669_s21 = int_to_ptr.vmem [resolvable:$false] %s668_s21 }
  0x54   : > { %s670_s29 = scalar_lea.vmem %s669_s21, 512  ;;  %p671_p10 = scmp.lt.s32.totalorder %s222_s30, %s669_s21 }
  0x55   : > { %p666_p5 = pnand %p664_p9, %p852_p12  ;;  %p672_p4 = scmp.lt.s32.totalorder %s670_s29, %s663_s13 }
  0x57   : > { %p667_p6 = pneg %p666_p5  ;;  %p673_p8 = por %p672_p4, %p671_p10 }
  0x59   : > { %p674_p1 = pnand %p673_p8, %p667_p6 }
  0x5b   : > { %677 = shalt.err (!%p674_p1)
}
  0x5c   : > { %p1013_p13 = scmp.ne.s32.totalorder %s1008_s28, 0  ;;  %s944_s10 = scalar_lea.hbm %s1002_s3, %s828_s27 }
  0x5d   : > { %s232_s12 = scalar_lea.vmem [#allocation7], %s825_s26  ;;  %s229_s6 = scalar_lea.sflag [#allocation8], %s822_s25 }
  0x5e   : > { %547 = dma.hbm_to_vmem [thread:$0]  (!%p1013_p13), %s897_s18, 256, %s222_s30, %s846_s9  }
  0x5f   : > { %s240_s14 = sshll.u32 %s232_s12, 4  ;;  %s678_s8 = scalar_lea.hbm %s944_s10, 256  ;;  %s241_s14 = int_to_ptr.vmem [resolvable:$true] %s240_s14 }
  0x60   : > { %p679_p8 = scmp.ne.s32.totalorder %s944_s10, %s678_s8  ;;  %s683_s18 = scalar_lea.hbm %s1002_s3, 768 }
  0x61   : > { %p684_p0 = scmp.lt.u32.totalorder %s944_s10, %s1002_s3  ;;  %p685_p3 = scmp.lt.u32.totalorder %s683_s18, %s678_s8 }
  0x62   : > { %p681_p11 = pnand %p679_p8, %p852_p12  ;;  %p687_p9 = scmp.lt.u32.totalorder %s678_s8, %s944_s10 }
  0x63   : > { %p686_p7 = por %p685_p3, %p684_p0 }
  0x64   : > { %p682_p2 = pneg %p681_p11 }
  0x65   : > { %p688_p5 = por %p687_p9, %p686_p7 }
  0x67   : > { %p689_p6 = pnand %p688_p5, %p682_p2 }
  0x69   : > { %692 = shalt.err (!%p689_p6)
}
  0x6a   : > { %s693_s25 = scalar_lea.vmem %s241_s14, 256  ;;  %s755_s26 = smov [#allocation7]  }
  0x6b   : > { %p694_p10 = scmp.ne.s32.totalorder %s241_s14, %s693_s25  ;;  %s698_s15 = sshll.u32 %s755_s26, 4  ;;  %s699_s15 = int_to_ptr.vmem [resolvable:$false] %s698_s15 }
  0x6c   : > { %s700_s21 = scalar_lea.vmem %s699_s15, 512  ;;  %p701_p8 = scmp.lt.s32.totalorder %s241_s14, %s699_s15 }
  0x6d   : > { %p696_p4 = pnand %p694_p10, %p852_p12  ;;  %p702_p11 = scmp.lt.s32.totalorder %s700_s21, %s693_s25 }
  0x6f   : > { %p697_p1 = pneg %p696_p4  ;;  %p703_p13 = por %p702_p11, %p701_p8 }
  0x71   : > { %p704_p0 = pnand %p703_p13, %p697_p1 }
  0x73   : > { %707 = shalt.err (!%p704_p0)
}
  0x74   : > { %p1014_p3 = scmp.ne.s32.totalorder %s1008_s28, 0  ;;  %p1015_p2 = scmp.ne.s32.totalorder %s1012_s7, 0 }
  0x75   : > { %s251_s11 = sand.u32 (!%p1015_p2), 1, %s742_s16   ;;  %p1016_p12 = scmp.ne.s32.totalorder (!%p1015_p2), %s1007_s24, 0 }
  0x76   : > { %550 = dma.hbm_to_vmem [thread:$0]  (!%p1014_p3), %s944_s10, 256, %s241_s14, %s229_s6  }
  0x77   : > { %249 = sbr.rel (%p1015_p2) target bundleno = 303 (0x12f), region = 36  ;;  %s519_s29 = sshll.u32 (!%p1015_p2), %s251_s11, 4 }
  0x78   : > { %s252_s22 = scalar_lea.sflag (!%p1015_p2), [#allocation3], %s251_s11  ;;  %s255_s5 = scalar_lea.vmem (!%p1015_p2), [#allocation2], %s519_s29 }
  0x7e   : > { %725 = dma.done.wait (%p1016_p12), %s252_s22, 256  }
  0x7f   : > { %727 = vsyncadd (%p1016_p12), %s252_s22, 4294967040  ;;  %s260_s12 = sand.u32 1, %s800_s19   ;;  %s264_s8 = scalar_lea.vmem [#allocation4], %s519_s29 }
  0x80   : > { %s261_s28 = scalar_lea.sflag [#allocation5], %s260_s12 }
  0x81   : > { %729 = dma.done.wait (%p1016_p12), %s261_s28, 512  }
  0x82   : > { %731 = vsyncadd (%p1016_p12), %s261_s28, 4294966784  ;;  %s273_s7 = scalar_lea.vmem [#allocation6], %s519_s29  ;;  %s279_s10 = scalar_lea.sflag [#allocation8], %s251_s11 }
  0x83   : > { %s282_s14 = scalar_lea.vmem [#allocation7], %s519_s29 }
  0x84   : > { %733 = dma.done.wait (%p1016_p12), %s279_s10, 256  }
  0x85   : > { %735 = vsyncadd (%p1016_p12), %s279_s10, 4294967040  ;;  %v347_v0 = vld [vmem:[%s264_s8] sm:$0xff]  ;;  %v348_v1 = vld [vmem:[%s264_s8 + $0x8] sm:$0xff]  ;;  %p321_p13 = scmp.lt.s32.totalorder %s800_s19, 2  ;;  %vm370_vm0 = vcmask 7168  }
  0x86   : > { %v325_v2 = vld [vmem:[%s255_s5] sm:$0xff]  ;;  %v356_v3 = vmul.f32 %v347_v0, %v347_v0  ;;  %v357_v4 = vmul.f32 %v348_v1, %v348_v1  ;;  %v326_v5 = vld [vmem:[%s255_s5 + $0x8] sm:$0xff] }
  0x87   : > { %v334_v6 = vmul.f32 %v325_v2, %v325_v2  ;;  %v349_v7 = vld [vmem:[%s282_s14] sm:$0xff]  ;;  %v350_v8 = vld [vmem:[%s282_s14 + $0x8] sm:$0xff]  ;;  %v335_v9 = vmul.f32 %v326_v5, %v326_v5  ;;  %s1022_s19 = smov (!%p321_p13, %s800_s19), 2 }
  0x88   : > { %v361_v10 = vmul.f32 %v349_v7, %v349_v7  ;;  %v362_v11 = vmul.f32 %v350_v8, %v350_v8  ;;  %v327_v12 = vld [vmem:[%s273_s7] sm:$0xff]  ;;  %v328_v13 = vld [vmem:[%s273_s7 + $0x8] sm:$0xff]  ;;  %v358_v14 = vadd.f32 %v357_v4, %v356_v3  ;;  %v351_v19 = vmul.f32 %v349_v7, %v347_v0  ;;  %s523_s24 = sshll.u32 %s1022_s19, 3 }
  0x89   : > { %v339_v15 = vmul.f32 %v327_v12, %v327_v12  ;;  %v340_v16 = vmul.f32 %v328_v13, %v328_v13  ;;  %v336_v17 = vadd.f32 %v335_v9, %v334_v6  ;;  %v352_v20 = vmul.f32 %v350_v8, %v348_v1  ;;  %s324_s9 = scalar_lea.vmem %s1003_s4, %s523_s24 }
  0x8a   : > { %359 = vadd.xlane.f32.xlu1 %v358_v14  ;;  %v363_v18 = vadd.f32 %v362_v11, %v361_v10  ;;  %v329_v22 = vmul.f32 %v327_v12, %v325_v2  ;;  %v330_v23 = vmul.f32 %v328_v13, %v326_v5 }
  0x8b   : > { %337 = vadd.xlane.f32.xlu0 %v336_v17  ;;  %v341_v21 = vadd.f32 %v340_v16, %v339_v15  ;;  %v353_v24 = vadd.f32 %v352_v20, %v351_v19 }
  0x8c   : > { %v331_v25 = vadd.f32 %v330_v23, %v329_v22 }
  0x8e   : > { %364 = vadd.xlane.f32.xlu1 %v363_v18 }
  0x8f   : > { %342 = vadd.xlane.f32.xlu0 %v341_v21 }
  0x92   : > { %354 = vadd.xlane.f32.xlu1 %v353_v24 }
  0x93   : > { %332 = vadd.xlane.f32.xlu0 %v331_v25 }
 0x117   : > { %v360_v26 = vpop.xlane.xlu1 %359 }
 0x118   : > { %v338_v27 = vpop.xlane.xlu0 %337 }
 0x11b   : > { %v365_v28 = vpop.xlane.xlu1 %364 }
 0x11c   : > { %v366_v29 = vmul.f32 %v365_v28, %v360_v26  ;;  %v343_v30 = vpop.xlane.xlu0 %342 }
 0x11d   : > { %v344_v31 = vmul.f32 %v343_v30, %v338_v27 }
 0x11e   : > { %584 = vrsqrt.f32 %v366_v29 }
 0x11f   : > { %586 = vrsqrt.f32 %v344_v31  ;;  %v355_v32 = vpop.xlane.xlu1 %354 }
 0x120   : > { %v333_v33 = vpop.xlane.xlu0 %332 }
 0x128   : > { %v585_v34 = vpop.eup %584 }
 0x129   : > { %v587_v35 = vpop.eup %586  ;;  %v368_v36 = vmul.f32 %v585_v34, %v355_v32 }
 0x12a   : > { %v346_v37 = vmul.f32 %v587_v35, %v333_v33 }
 0x12c   : > { %v369_v38 = vadd.f32 %v368_v36, %v346_v37 }
 0x12e   : > { %371 = vst.msk [vmem:[%s324_s9] sm:$0xff] %vm370_vm0, %v369_v38 }
 0x12f PF: > { %p20_p7 = scmp.ge.s32.totalorder %s803_s20, 5   ;;  %s1017_s15 = smov %s742_s16 }
 0x130   : > { %s1018_s16 = smov %s746_s17  ;;  %s1019_s17 = smov %s813_s23 }
 0x131   : > { %s1020_s18 = smov %s803_s20  ;;  %22 = sbr.rel (!%p20_p7) target bundleno = 7 (0x7), region = 113 }
 0x138   :  { %391 = vsyncpa [#allocation3], 1 }
 0x139   :  { %393 = vsyncpa [#allocation3 + $0x1], 1 }
 0x13a   :  { %394 = vsyncpa [#allocation5], 1 }
 0x13b   :  { %396 = vsyncpa [#allocation5 + $0x1], 1 }
 0x13c   :  { %397 = vsyncpa [#allocation8], 1 }
 0x13d   :  { %399 = vsyncpa [#allocation8 + $0x1], 1 }

</bundles_post_ra>
